<compile_context>
chip_gen: v6e
topology: v6e:2x2x1
jax: 0.10.0
libtpu: 0.0.40
codegen_flags: <defaults>
</compile_context>

<pallas_src>
import functools

import numpy as np
import jax
import jax.numpy as jnp
from jax.experimental import pallas as pl
from jax.experimental.pallas import tpu as pltpu


# ----------------------------------------------------------------------------
# Parameter initialization (torch-equivalent layouts)
# ----------------------------------------------------------------------------

def init_params(key):
    def lin(k, fin, fout):
        k1, k2 = jax.random.split(k)
        bound = fin ** -0.5
        w = jax.random.uniform(k1, (fin, fout), jnp.float32, -bound, bound)
        b = jax.random.uniform(k2, (fout,), jnp.float32, -bound, bound)
        return w, b

    def conv(k, cin, cout):
        k1, k2 = jax.random.split(k)
        bound = (cin * 9) ** -0.5
        w = jax.random.uniform(k1, (3, 3, cin, cout), jnp.float32, -bound, bound)
        b = jax.random.uniform(k2, (cout,), jnp.float32, -bound, bound)
        return w, b

    ks = jax.random.split(key, 10)
    return {
        "fc1": lin(ks[0], 10, 512),
        "fc2": lin(ks[1], 512, 1024),
        "fc3": lin(ks[2], 1024, 2048),
        "fc4": lin(ks[3], 2048, 4096),
        "conv1": conv(ks[4], 16, 32),
        "conv2": conv(ks[5], 32, 32),
        "conv3": conv(ks[6], 8, 16),
        "conv4": conv(ks[7], 16, 16),
        "conv5": conv(ks[8], 4, 8),
        "conv6": conv(ks[9], 8, 4),
    }


# ----------------------------------------------------------------------------
# Host-side parameter prep: permutations, banded conv matrices, quantization
# ----------------------------------------------------------------------------

def _fc4_perm():
    """Output-feature permutation so fc4's output reshapes row-major into the
    conv stack's (H, W*Cin) layout straight from torch's view(-1,16,16,16)."""
    j = np.arange(4096)
    h = j // 256
    rem = j % 256
    w = rem // 16
    c = rem % 16
    return c * 256 + h * 16 + w                      # new col j <- old col perm[j]


def _shuffle_perm(S, Cout):
    """Column permutation so a pre-shuffle conv's output row h reads as
    [shuffled image row 2h | image row 2h+1] in lane order w'*c0n + c0."""
    c0n = Cout // 4
    L = 2 * S * c0n
    perm = np.zeros(2 * L, np.int64)
    for i in range(2):
        for q in range(L):
            wp, c0 = q // c0n, q % c0n
            w, j = wp // 2, wp % 2
            perm[i * L + q] = w * Cout + c0 * 4 + 2 * i + j
    return perm


def _quant_cols(w):
    """Symmetric int8 per-output-column quantization of a (K, N) weight."""
    s = np.max(np.abs(w), axis=0, keepdims=True) / 127.0
    s = np.maximum(s, 1e-30).astype(np.float32)
    q = np.clip(np.rint(w / s), -127, 127).astype(np.int8)
    return q, s


def prepare_params(params):
    """Returns (prep, refp): kernel-layout params and reference-layout params."""
    prep, refp = {}, {}

    # ---- linears: fc1/fc2 bf16, fc3/fc4 int8 + per-column f32 scales ----
    for name, quantize in (("fc1", False), ("fc2", False),
                           ("fc3", True), ("fc4", True)):
        w, b = params[name]
        w = np.asarray(w, np.float32)
        b = np.asarray(b, np.float32)
        if quantize:
            q, s = _quant_cols(w)
            refp[name + "_q"] = jnp.asarray(q)
            refp[name + "_s"] = jnp.asarray(s)
            refp[name + "_b"] = jnp.asarray(b.reshape(1, -1), jnp.float32)
            if name == "fc4":
                perm = _fc4_perm()
                q, s, b = q[:, perm], s[:, perm], b[perm]
            prep[name + "_q"] = jnp.asarray(q)
            prep[name + "_s"] = jnp.asarray(s)
            prep[name + "_b"] = jnp.asarray(b.reshape(1, -1), jnp.float32)
        else:
            wb = jnp.asarray(w, jnp.bfloat16)
            bb = jnp.asarray(b.reshape(1, -1), jnp.float32)
            prep[name + "_w"] = wb
            prep[name + "_b"] = bb
            refp[name + "_w"] = wb
            refp[name + "_b"] = bb

    # ---- conv tail: banded bf16 matrices + lane-tiled f32 biases ----
    conv_cfg = [  # (name, spatial S, followed_by_pixel_shuffle)
        ("conv1", 16, False),
        ("conv2", 16, True),
        ("conv3", 32, False),
        ("conv4", 32, True),
        ("conv5", 64, False),
        ("conv6", 64, True),
    ]
    for name, S, shuffled in conv_cfg:
        wt, b = params[name]
        wt = np.asarray(wt, np.float32)              # (3, 3, Cin, Cout)
        b = np.asarray(b, np.float32)
        refp[name + "_w"] = jnp.asarray(wt)
        refp[name + "_b"] = jnp.asarray(b)
        Cin, Cout = wt.shape[2], wt.shape[3]
        # M[dh, wi*Cin + ci, wo*Cout + co] = wt[dh, dw, ci, co], dw = wi - wo + 1.
        M = np.zeros((3, S * Cin, S * Cout), np.float32)
        for dh in range(3):
            for dw in range(3):
                for wo in range(S):
                    wi = wo + dw - 1
                    if 0 <= wi < S:
                        M[dh, wi * Cin:(wi + 1) * Cin,
                          wo * Cout:(wo + 1) * Cout] = wt[dh, dw]
        brow = np.tile(b, S)                         # lane order w*Cout + co
        if shuffled:
            perm = _shuffle_perm(S, Cout)
            M = M[:, :, perm]
            brow = brow[perm]
        prep[name + "_m"] = jnp.asarray(M, jnp.bfloat16)
        prep[name + "_b"] = jnp.asarray(brow.reshape(1, -1), jnp.float32)

    # ---- pixel-shuffle row-interleave matrices (exact 0/1 permutations) ----
    # Intermediate ones in bf16 (their consumers cast to bf16 anyway); the
    # final one (feeding the f32 output) stays f32.
    for size, dt in ((32, jnp.bfloat16), (64, jnp.bfloat16), (128, jnp.float32)):
        half = size // 2
        pe = np.zeros((size, half), np.float32)      # row 2h <- E[h]
        po = np.zeros((size, half), np.float32)      # row 2h+1 <- O[h]
        idx = np.arange(half)
        pe[2 * idx, idx] = 1.0
        po[2 * idx + 1, idx] = 1.0
        prep[f"pe{size}"] = jnp.asarray(pe, dt)
        prep[f"po{size}"] = jnp.asarray(po, dt)
    return prep, refp


# ----------------------------------------------------------------------------
# Shared dynamic (per-row) activation quantization — used by kernel and ref
# ----------------------------------------------------------------------------

def _rowquant(h):
    """h >= 0 (post-ReLU).  Returns (int8 codes, per-row f32 scale)."""
    m = jnp.max(h, axis=-1, keepdims=True)
    inv = 127.0 / jnp.maximum(m, 1e-30)
    q = jnp.clip(jnp.floor(h * inv + 0.5), 0.0, 127.0)
    return q.astype(jnp.int32).astype(jnp.int8), m * (1.0 / 127.0)


# ----------------------------------------------------------------------------
# Fused MLP kernel: fc1 -> fc2 (bf16) -> fc3 -> fc4 (int8 weights), all + ReLU
# ----------------------------------------------------------------------------

def _mlp_kernel(x_ref, w1, b1, w2, b2, w3q, s3, b3, w4q, s4, b4, o_ref):
    f32 = jnp.float32

    def dense_bf16(h, w_ref, b_ref):
        y = jnp.dot(h.astype(jnp.bfloat16), w_ref[...], preferred_element_type=f32)
        return jnp.maximum(y + b_ref[...], 0.0)

    def dense_int8(h, wq_ref, s_ref, b_ref):
        q, sa = _rowquant(h)                               # int8 activations
        acc = jnp.dot(q, wq_ref[...], preferred_element_type=jnp.int32)
        y = acc.astype(f32) * sa * s_ref[...]              # row * column scales
        return jnp.maximum(y + b_ref[...], 0.0)

    h = dense_bf16(x_ref[...], w1, b1)
    h = dense_bf16(h, w2, b2)
    h = dense_int8(h, w3q, s3, b3)
    h = dense_int8(h, w4q, s4, b4)
    o_ref[...] = h.astype(o_ref.dtype)                     # bf16 handoff


def mlp_forward(prep, x, *, tn=1024):
    Bp, K = x.shape
    N = prep["fc4_q"].shape[1]
    full = lambda j: (0, 0)
    tile = lambda j: (0, j)
    in_specs = [
        pl.BlockSpec((Bp, K), full),
        pl.BlockSpec(prep["fc1_w"].shape, full), pl.BlockSpec(prep["fc1_b"].shape, full),
        pl.BlockSpec(prep["fc2_w"].shape, full), pl.BlockSpec(prep["fc2_b"].shape, full),
        pl.BlockSpec(prep["fc3_q"].shape, full), pl.BlockSpec(prep["fc3_s"].shape, full),
        pl.BlockSpec(prep["fc3_b"].shape, full),
        pl.BlockSpec((prep["fc4_q"].shape[0], tn), tile),
        pl.BlockSpec((1, tn), tile),
        pl.BlockSpec((1, tn), tile),
    ]
    return pl.pallas_call(
        _mlp_kernel,
        out_shape=jax.ShapeDtypeStruct((Bp, N), jnp.bfloat16),
        grid_spec=pltpu.PrefetchScalarGridSpec(
            num_scalar_prefetch=0,
            grid=(N // tn,),
            in_specs=in_specs,
            out_specs=pl.BlockSpec((Bp, tn), tile),
        ),
        compiler_params=pltpu.CompilerParams(
            dimension_semantics=("parallel",),
            vmem_limit_bytes=32 * 1024 * 1024),
    )(x, prep["fc1_w"], prep["fc1_b"], prep["fc2_w"], prep["fc2_b"],
      prep["fc3_q"], prep["fc3_s"], prep["fc3_b"],
      prep["fc4_q"], prep["fc4_s"], prep["fc4_b"])


# ----------------------------------------------------------------------------
# Fused conv tail: conv1..conv6 + pixel shuffles + (1 - sigmoid), one kernel
# ----------------------------------------------------------------------------

def _conv_block(x, m_ref, b_ref, *, relu, roll_like_jnp):
    """3x3 'same' conv in (H, W*Cin) -> (H, W*Cout) lane-dense layout.

    Three MXU matmuls against banded bf16 weights (one per kernel row); the
    +/-1 row taps are an XLU sublane roll plus a one-row zero mask (VPU)."""
    S = x.shape[0]
    xb = x.astype(jnp.bfloat16)
    p0 = jnp.dot(xb, m_ref[0], preferred_element_type=jnp.float32)
    p1 = jnp.dot(xb, m_ref[1], preferred_element_type=jnp.float32)
    p2 = jnp.dot(xb, m_ref[2], preferred_element_type=jnp.float32)
    # want: y[h] = p1[h] + p0[h-1] + p2[h+1], zero beyond the image boundary
    dsh = 1 if roll_like_jnp else S - 1            # roll realizing out[h] = in[h-1]
    ush = S - 1 if roll_like_jnp else 1            # roll realizing out[h] = in[h+1]
    row = jax.lax.broadcasted_iota(jnp.int32, p1.shape, 0)
    down = jnp.where(row == 0, 0.0, pltpu.roll(p0, dsh, 0))
    up = jnp.where(row == S - 1, 0.0, pltpu.roll(p2, ush, 0))
    y = p1 + down + up + b_ref[...]
    return jnp.maximum(y, 0.0) if relu else y


def _interleave(y, pe_ref, po_ref):
    """Pixel-shuffle row interleave: y (S, 2L) = [even rows | odd rows]
    -> (2S, L), via two exact 0/1 permutation matmuls."""
    L = y.shape[1] // 2
    dt = pe_ref.dtype
    e = y[:, :L].astype(dt)
    o = y[:, L:].astype(dt)
    return (jnp.dot(pe_ref[...], e, preferred_element_type=jnp.float32)
            + jnp.dot(po_ref[...], o, preferred_element_type=jnp.float32))


def _conv_tail_kernel(roll_like_jnp, x_ref,
                      m1, b1, m2, b2, m3, b3, m4, b4, m5, b5, m6, b6,
                      pe32, po32, pe64, po64, pe128, po128,
                      o_ref):
    cb = functools.partial(_conv_block, roll_like_jnp=roll_like_jnp)
    x = cb(x_ref[0], m1, b1, relu=True)                     # (16, 512)
    y = cb(x, m2, b2, relu=False)                           # (16, 512) = [E | O]
    x = _interleave(y, pe32, po32)                          # (32, 256)
    x = cb(x, m3, b3, relu=True)                            # (32, 512)
    y = cb(x, m4, b4, relu=False)                           # (32, 512) = [E | O]
    x = _interleave(y, pe64, po64)                          # (64, 256)
    x = cb(x, m5, b5, relu=True)                            # (64, 512)
    y = cb(x, m6, b6, relu=False)                           # (64, 256) = [E | O]
    y = 1.0 - jax.nn.sigmoid(y)                             # elementwise: commutes
    o_ref[0] = _interleave(y, pe128, po128)                 # (128, 128) lane-dense


def conv_tail(prep, img, *, roll_like_jnp=True):
    B = img.shape[0]
    f2 = lambda b: (0, 0)
    f3 = lambda b: (0, 0, 0)
    bat = lambda b: (b, 0, 0)

    arrays = [img]
    in_specs = [pl.BlockSpec((1, 16, 256), bat)]
    for name in ("conv1", "conv2", "conv3", "conv4", "conv5", "conv6"):
        m = prep[name + "_m"]
        bb = prep[name + "_b"]
        arrays += [m, bb]
        in_specs += [pl.BlockSpec(m.shape, f3), pl.BlockSpec(bb.shape, f2)]
    for size in (32, 64, 128):
        arrays += [prep[f"pe{size}"], prep[f"po{size}"]]
        in_specs += [pl.BlockSpec((size, size // 2), f2),
                     pl.BlockSpec((size, size // 2), f2)]

    kernel = functools.partial(_conv_tail_kernel, roll_like_jnp)
    return pl.pallas_call(
        kernel,
        out_shape=jax.ShapeDtypeStruct((B, 128, 128), jnp.float32),
        grid_spec=pltpu.PrefetchScalarGridSpec(
            num_scalar_prefetch=0,
            grid=(B,),
            in_specs=in_specs,
            out_specs=pl.BlockSpec((1, 128, 128), bat),
        ),
        compiler_params=pltpu.CompilerParams(
            dimension_semantics=("parallel",),
            vmem_limit_bytes=32 * 1024 * 1024),
    )(*arrays)


# ----------------------------------------------------------------------------
# Roll direction probe (one tiny kernel, run once): makes the +/-1 row taps
# independent of pltpu.roll's shift-sign convention.
# ----------------------------------------------------------------------------

def roll_matches_jnp():
    def k(x_ref, o_ref):
        o_ref[...] = pltpu.roll(x_ref[...], 1, 0)

    x = jnp.broadcast_to(jnp.arange(8, dtype=jnp.float32)[:, None], (8, 128))
    y = pl.pallas_call(k, out_shape=jax.ShapeDtypeStruct((8, 128), jnp.float32))(x)
    # jnp.roll(x, 1, 0)[0] == x[-1] == 7.0
    return bool(y[0, 0] == 7.0)


# ----------------------------------------------------------------------------
# Forward pass
# ----------------------------------------------------------------------------

def fcn_forward(prep, x, *, roll_like_jnp=True):
    B = x.shape[0]
    Bp = max(8, ((B + 7) // 8) * 8)                 # full sublane occupancy
    xp = jnp.pad(x, ((0, Bp - B), (0, 0)))
    h = mlp_forward(prep, xp)                       # (Bp, 4096) bf16, fc4 cols permuted
    img = h[:B].reshape(B, 16, 256)                 # (B, H=16, W*Cin=256) bf16
    return conv_tail(prep, img, roll_like_jnp=roll_like_jnp)   # (B, 128, 128) f32


# ----------------------------------------------------------------------------
# Pure-JAX reference (same prepared/quantized params; real conv + pixel shuffle)
# ----------------------------------------------------------------------------

def reference_forward(refp, x):
    bf = jnp.bfloat16
    f32 = jnp.float32

    def dense_bf16(h, w, b):
        y = jnp.dot(h.astype(bf), w, preferred_element_type=f32)
        return jnp.maximum(y + b, 0.0)

    def dense_int8(h, wq, ws, b):
        q, sa = _rowquant(h)
        acc = jnp.dot(q, wq, preferred_element_type=jnp.int32)
        return jnp.maximum(acc.astype(f32) * sa * ws + b, 0.0)

    h = dense_bf16(x, refp["fc1_w"], refp["fc1_b"])
    h = dense_bf16(h, refp["fc2_w"], refp["fc2_b"])
    h = dense_int8(h, refp["fc3_q"], refp["fc3_s"], refp["fc3_b"])
    h = dense_int8(h, refp["fc4_q"], refp["fc4_s"], refp["fc4_b"])

    B = x.shape[0]
    z = h.reshape(B, 16, 16, 16)                    # NCHW, as torch's view()

    def conv(z, w, b, relu):
        y = jax.lax.conv_general_dilated(
            z.astype(bf), w.astype(bf), (1, 1), "SAME",
            dimension_numbers=("NCHW", "HWIO", "NCHW"),
            preferred_element_type=f32)
        y = y + b[None, :, None, None]
        return jnp.maximum(y, 0.0) if relu else y

    def shuffle(z):                                 # PixelShuffle(2)
        b_, c, hh, ww = z.shape
        z = z.reshape(b_, c // 4, 2, 2, hh, ww)
        z = z.transpose(0, 1, 4, 2, 5, 3)
        return z.reshape(b_, c // 4, hh * 2, ww * 2)

    z = conv(z, refp["conv1_w"], refp["conv1_b"], True)
    z = shuffle(conv(z, refp["conv2_w"], refp["conv2_b"], False))
    z = conv(z, refp["conv3_w"], refp["conv3_b"], True)
    z = shuffle(conv(z, refp["conv4_w"], refp["conv4_b"], False))
    z = conv(z, refp["conv5_w"], refp["conv5_b"], True)
    z = shuffle(conv(z, refp["conv6_w"], refp["conv6_b"], False))
    z = 1.0 - jax.nn.sigmoid(z)
    return z.reshape(B, 128, 128)


if __name__ == "__main__":
    key = jax.random.PRNGKey(0)
    pkey, xkey = jax.random.split(key)
    params = init_params(pkey)
    prep, refp = prepare_params(params)
    roll_jnp = roll_matches_jnp()

    x = jax.random.normal(xkey, (2, 10), jnp.float32)

    fwd = jax.jit(functools.partial(fcn_forward, roll_like_jnp=roll_jnp))
    out = jax.block_until_ready(fwd(prep, x))
    assert out.shape == (2, 128, 128), out.shape
    assert out.dtype == jnp.float32

    ref = jax.block_until_ready(jax.jit(reference_forward)(refp, x))
    err = float(jnp.max(jnp.abs(out - ref)))
    assert err < 2e-2, f"max abs diff vs reference: {err}"
    print("KERNEL_OK")
</pallas_src>

<mosaic_0001>
module attributes {stable_mosaic.version = 11 : i64} {
  func.func @k(%arg0: memref<8x128xf32, #tpu.memory_space<vmem>>, %arg1: memref<8x128xf32, #tpu.memory_space<vmem>>) attributes {dimension_semantics = [], scalar_prefetch = 0 : i64, scratch_operands = 0 : i64, tpu.core_type = #tpu.core_type<tc>} {
    %c0 = arith.constant 0 : index
    %c0_0 = arith.constant 0 : index
    %0 = vector.load %arg0[%c0, %c0_0] : memref<8x128xf32, #tpu.memory_space<vmem>>, vector<8x128xf32>
    %c1_i32 = arith.constant 1 : i32
    %1 = tpu.dynamic_rotate %0 by %c1_i32 dim 0 : vector<8x128xf32>, i32 -> vector<8x128xf32>
    %c0_1 = arith.constant 0 : index
    %c0_2 = arith.constant 0 : index
    %2 = vector.load %arg1[%c0_1, %c0_2] : memref<8x128xf32, #tpu.memory_space<vmem>>, vector<8x128xf32>
    tpu.vector_store %arg1[%c0_1, %c0_2], %1 {strides = array<i32>} : memref<8x128xf32, #tpu.memory_space<vmem>>, vector<8x128xf32>,
    return
  }
}

</mosaic_0001>

<bundles_post_ra>
// kernel: tpu_custom_call.1
= control target key start
LH: loop header
LB: loop body
LE: loop exit
PB: predicated region body
PF: predicated region fallthrough
CT: control target
= control target key end

     0   :  { %6 = vsyncpa [#allocation3], 0  ;;  %s103_s0 = inlined_call_operand.hbm [shape: f32[8,128], index: 0, kind: input, shape index: {}]   ;;  %s104_s1 = inlined_call_operand.hbm [shape: f32[8,128], index: 1, kind: output, shape index: {}]  }
   0x1   :  { %7 = vsyncpa [#allocation4], 0  ;;  %s85_s6 = smov [#allocation2]  }
   0x2   :  { %s14_s7 = sshll.u32 %s85_s6, 4  ;;  %s15_s7 = int_to_ptr.vmem [resolvable:$true] %s14_s7 }
   0x3   :  { %s49_s8 = scalar_lea.vmem %s15_s7, 128  ;;  %p54_p1 = scmp.lt.s32.totalorder %s15_s7, %s15_s7 }
   0x4   :  { %p50_p0 = scmp.ne.s32.totalorder %s15_s7, %s49_s8  ;;  %p55_p2 = scmp.lt.s32.totalorder %s49_s8, %s49_s8 }
   0x6   :  { %p56_p3 = por %p55_p2, %p54_p1 }
   0x8   :  { %p57_p4 = pnand %p56_p3, %p50_p0 }
   0xa   :  { %60 = shalt.err (!%p57_p4)
}
   0xb   :  { %17 = dma.hbm_to_vmem [thread:$0]  %s103_s0, 128, %s15_s7, [#allocation3]  }
   0xc   :  { %81 = dma.done.wait [#allocation3], 128  }
   0xd   :  { %82 = vsyncadd [#allocation3], 4294967168  ;;  %s86_s11 = smov [#allocation5]   ;;  %v21_v0 = vld [vmem:[#allocation2] sm:$0xff] }
   0xe   :  { %s30_s12 = sshll.u32 %s86_s11, 4  ;;  %v22_v1 = vrot.slane %v21_v0, 7  ;;  %s31_s12 = int_to_ptr.vmem [resolvable:$true] %s30_s12 }
   0xf   :  { %s61_s13 = scalar_lea.vmem %s31_s12, 128  ;;  %p66_p6 = scmp.lt.s32.totalorder %s31_s12, %s31_s12 }
  0x10   :  { %23 = vst [vmem:[#allocation5] sm:$0xff] %v22_v1  ;;  %p62_p5 = scmp.ne.s32.totalorder %s31_s12, %s61_s13  ;;  %p67_p7 = scmp.lt.s32.totalorder %s61_s13, %s61_s13 }
  0x12   :  { %p68_p8 = por %p67_p7, %p66_p6 }
  0x14   :  { %p69_p9 = pnand %p68_p8, %p62_p5 }
  0x16   :  { %72 = shalt.err (!%p69_p9)
}
  0x17   :  { %33 = dma.vmem_to_hbm [thread:$0]  %s31_s12, 128, %s104_s1, [#allocation4]  }
  0x18   :  { %83 = dma.done.wait [#allocation4], 128  }
  0x19   :  { %84 = vsyncadd [#allocation4], 4294967168 }
  0x1a   :  { %37 = vsyncpa [#allocation3], 1 }
  0x1b   :  { %38 = vsyncpa [#allocation4], 1 }

</bundles_post_ra>
